<compile_context>
chip_gen: v7x
topology: tpu7x:2x2x1
jax: 0.10.0
libtpu: 0.0.40
codegen_flags: <defaults>
</compile_context>

<pallas_src>
import functools

import jax
import jax.numpy as jnp
from jax.experimental import pallas as pl
from jax.experimental.pallas import tpu as pltpu


# ----------------------------------------------------------------------------
# Fused Pallas kernel: whole backbone for one (batch item, H*W tile)
# ----------------------------------------------------------------------------

def _fused_backbone_kernel(x_ref, w_ref, b_ref, o_ref, *,
                           num_paths, num_stages, C, vertical):
    # x_ref: (1, C, T)              one batch item, one lane tile of H*W
    # w_ref: (S, P*C, C)            stage-stacked, path-packed (Cout, Cin)
    # b_ref: (S, P*C, 1)
    # o_ref: (P, 1, C, T)
    x = x_ref[0]                                      # (C, T)

    def stage_all_paths(inp, s):
        # One MXU matmul computes every path of stage s: (P*C, C) @ (C, T).
        y = jnp.dot(w_ref[s], inp, preferred_element_type=jnp.float32)
        y = jnp.maximum(y + b_ref[s], 0.0)
        return [y[p * C:(p + 1) * C, :] for p in range(num_paths)]

    if vertical:
        # path p consumes the output of path p-1 (torch.clone semantics).
        w0 = w_ref[0]
        b0 = b_ref[0]
        outs = []
        inp = x
        for p in range(num_paths):
            y = jnp.dot(w0[p * C:(p + 1) * C, :], inp,
                        preferred_element_type=jnp.float32)
            y = jnp.maximum(y + b0[p * C:(p + 1) * C, :], 0.0)
            outs.append(y)
            inp = y
    else:
        outs = stage_all_paths(x, 0)

    for s in range(1, num_stages):
        # fusions_s{s}: every path receives the sum of all previous outputs.
        fused = outs[0]
        for p in range(1, num_paths):
            fused = fused + outs[p]
        outs = stage_all_paths(fused, s)

    for p in range(num_paths):
        o_ref[p, 0, :, :] = outs[p].astype(o_ref.dtype)


# ----------------------------------------------------------------------------
# Wrapper
# ----------------------------------------------------------------------------

_LANE = 128


def _pick_lane_tile(hw_pad):
    tile = _LANE
    while tile * 2 <= min(hw_pad, 1024) and hw_pad % (tile * 2) == 0:
        tile *= 2
    return tile


def multi_io_net_backbone(x_nchw, params, num_paths, num_stages,
                          vertical_connect_stage0=False):
    N, C, H, W = x_nchw.shape
    HW = H * W

    # NCHW -> (N, C, HW): a pure view, no transpose.
    x3 = x_nchw.reshape(N, C, HW)
    hw_pad = ((HW + _LANE - 1) // _LANE) * _LANE
    if hw_pad != HW:
        x3 = jnp.pad(x3, ((0, 0), (0, 0), (0, hw_pad - HW)))
    tile = _pick_lane_tile(hw_pad)

    # Pack per-path conv weights (Cout, Cin) along Cout, stack over stages.
    w_packed = jnp.stack([
        jnp.concatenate([params[f"path{p}_s{s}_w"] for p in range(num_paths)],
                        axis=0)
        for s in range(num_stages)], axis=0)                  # (S, P*C, C)
    b_packed = jnp.stack([
        jnp.concatenate([params[f"path{p}_s{s}_b"].reshape(C, 1)
                         for p in range(num_paths)], axis=0)
        for s in range(num_stages)], axis=0)                  # (S, P*C, 1)

    grid = (N, hw_pad // tile)
    kernel = functools.partial(
        _fused_backbone_kernel, num_paths=num_paths, num_stages=num_stages,
        C=C, vertical=vertical_connect_stage0)

    out = pl.pallas_call(
        kernel,
        out_shape=jax.ShapeDtypeStruct((num_paths, N, C, hw_pad), x_nchw.dtype),
        grid=grid,
        in_specs=[
            pl.BlockSpec((1, C, tile), lambda n, t: (n, 0, t)),
            pl.BlockSpec((num_stages, num_paths * C, C), lambda n, t: (0, 0, 0)),
            pl.BlockSpec((num_stages, num_paths * C, 1), lambda n, t: (0, 0, 0)),
        ],
        out_specs=pl.BlockSpec((num_paths, 1, C, tile),
                               lambda n, t: (0, n, 0, t)),
        compiler_params=pltpu.CompilerParams(
            dimension_semantics=("parallel", "parallel")),
    )(x3, w_packed, b_packed)

    out = out[..., :HW].reshape(num_paths, N, C, H, W)
    # header is None -> return list of per-path outputs in NCHW.
    return [out[p] for p in range(num_paths)]


# ----------------------------------------------------------------------------
# Pure-JAX reference (correctness check)
# ----------------------------------------------------------------------------

def _reference(x_nchw, params, num_paths, num_stages,
               vertical_connect_stage0=False):
    N, C, H, W = x_nchw.shape
    x2d = jnp.transpose(x_nchw, (0, 2, 3, 1)).reshape(N * H * W, C)

    def conv(x, w, b):                     # w: (Cout, Cin), b: (Cout,)
        return jnp.maximum(x @ w.T + b[None, :], 0.0)

    if vertical_connect_stage0:
        outputs = []
        inp = x2d
        for p in range(num_paths):
            out = conv(inp, params[f"path{p}_s0_w"], params[f"path{p}_s0_b"])
            outputs.append(out)
            inp = out
    else:
        outputs = [conv(x2d, params[f"path{p}_s0_w"], params[f"path{p}_s0_b"])
                   for p in range(num_paths)]
    for s in range(1, num_stages):
        total = outputs[0]
        for o in outputs[1:]:
            total = total + o
        outputs = [conv(total, params[f"path{p}_s{s}_w"],
                        params[f"path{p}_s{s}_b"])
                   for p in range(num_paths)]
    return [jnp.transpose(o.reshape(N, H, W, C), (0, 3, 1, 2))
            for o in outputs]


if __name__ == "__main__":
    NUM_PATHS, NUM_STAGES = 2, 3
    N, C, H, W = 2, 8, 16, 16          # small shapes; H*W = 256 (2 lane tiles)

    key = jax.random.PRNGKey(0)
    kx, *kw = jax.random.split(key, 1 + 2 * NUM_PATHS * NUM_STAGES)
    x = jax.random.normal(kx, (N, C, H, W), dtype=jnp.float32)

    # Deterministic synthetic parameters (PyTorch conv layout: (Cout, Cin)).
    params = {}
    ki = iter(kw)
    for p in range(NUM_PATHS):
        for s in range(NUM_STAGES):
            params[f"path{p}_s{s}_w"] = (
                jax.random.normal(next(ki), (C, C), dtype=jnp.float32) * 0.2)
            params[f"path{p}_s{s}_b"] = (
                jax.random.normal(next(ki), (C,), dtype=jnp.float32) * 0.1)

    # Default config of the module instantiation: parallel stage 0.
    fwd = jax.jit(functools.partial(
        multi_io_net_backbone, num_paths=NUM_PATHS, num_stages=NUM_STAGES,
        vertical_connect_stage0=False))
    outs = [jax.block_until_ready(o) for o in fwd(x, params)]
    refs = _reference(x, params, NUM_PATHS, NUM_STAGES, False)
    for o, r in zip(outs, refs):
        assert o.shape == (N, C, H, W)
        assert jnp.allclose(o, r, atol=1e-4, rtol=1e-4), \
            "mismatch vs reference (parallel stage0)"

    # Also exercise the vertical_connect_stage0=True branch of the module.
    fwd_v = jax.jit(functools.partial(
        multi_io_net_backbone, num_paths=NUM_PATHS, num_stages=NUM_STAGES,
        vertical_connect_stage0=True))
    outs_v = [jax.block_until_ready(o) for o in fwd_v(x, params)]
    refs_v = _reference(x, params, NUM_PATHS, NUM_STAGES, True)
    for o, r in zip(outs_v, refs_v):
        assert jnp.allclose(o, r, atol=1e-4, rtol=1e-4), \
            "mismatch vs reference (vertical stage0)"

    print("KERNEL_OK")
</pallas_src>

<mosaic_0001>
module attributes {stable_mosaic.version = 11 : i64} {
  func.func @_fused_backbone_kernel(%arg0: i32, %arg1: i32, %arg2: memref<1x8x256xf32, #tpu.memory_space<vmem>>, %arg3: memref<3x16x8xf32, #tpu.memory_space<vmem>>, %arg4: memref<3x16x1xf32, #tpu.memory_space<vmem>>, %arg5: memref<2x1x8x256xf32, #tpu.memory_space<vmem>>) attributes {dimension_semantics = [#tpu.dimension_semantics<parallel>, #tpu.dimension_semantics<parallel>], iteration_bounds = array<i64: 2, 1>, scalar_prefetch = 0 : i64, scratch_operands = 0 : i64, tpu.core_type = #tpu.core_type<tc>, window_params = [{transform_indices = @transform_0, window_bounds = array<i64: 1, 8, 256>}, {pipeline_mode = #tpu.pipeline_mode<synchronous>, transform_indices = @transform_1, window_bounds = array<i64: 3, 16, 8>}, {pipeline_mode = #tpu.pipeline_mode<synchronous>, transform_indices = @transform_2, window_bounds = array<i64: 3, 16, 1>}, {transform_indices = @transform_3, window_bounds = array<i64: 2, 1, 8, 256>}]} {
    %c0 = arith.constant 0 : index
    %c0_0 = arith.constant 0 : index
    %c0_1 = arith.constant 0 : index
    %0 = vector.load %arg2[%c0, %c0_0, %c0_1] : memref<1x8x256xf32, #tpu.memory_space<vmem>>, vector<1x8x256xf32>
    %1 = vector.shape_cast %0 : vector<1x8x256xf32> to vector<8x256xf32>
    %c0_2 = arith.constant 0 : index
    %c0_3 = arith.constant 0 : index
    %c0_4 = arith.constant 0 : index
    %2 = vector.load %arg3[%c0_2, %c0_3, %c0_4] : memref<3x16x8xf32, #tpu.memory_space<vmem>>, vector<1x16x8xf32>
    %3 = vector.shape_cast %2 : vector<1x16x8xf32> to vector<16x8xf32>
    %cst = arith.constant dense<0.000000e+00> : vector<16x256xf32>
    %4 = tpu.matmul %3, %1, %cst {dimension_numbers = #tpu.dot_dimension_numbers<[1], [0], [0], [1], [0, 0, 1, 1], [], []>} : vector<16x8xf32>, vector<8x256xf32>, vector<16x256xf32> -> vector<16x256xf32>
    %c0_5 = arith.constant 0 : index
    %c0_6 = arith.constant 0 : index
    %c0_7 = arith.constant 0 : index
    %5 = vector.load %arg4[%c0_5, %c0_6, %c0_7] : memref<3x16x1xf32, #tpu.memory_space<vmem>>, vector<1x16x1xf32>
    %6 = vector.shape_cast %5 : vector<1x16x1xf32> to vector<16x1xf32>
    %7 = vector.broadcast %6 : vector<16x1xf32> to vector<16x256xf32>
    %8 = arith.addf %4, %7 : vector<16x256xf32>
    %cst_8 = arith.constant 0.000000e+00 : f32
    %9 = vector.broadcast %cst_8 : f32 to vector<16x256xf32>
    %10 = arith.maximumf %8, %9 : vector<16x256xf32>
    %11 = vector.extract_strided_slice %10 {offsets = [0, 0], sizes = [8, 256], strides = [1, 1]} : vector<16x256xf32> to vector<8x256xf32>
    %12 = vector.extract_strided_slice %10 {offsets = [8, 0], sizes = [8, 256], strides = [1, 1]} : vector<16x256xf32> to vector<8x256xf32>
    %13 = arith.addf %11, %12 : vector<8x256xf32>
    %c1 = arith.constant 1 : index
    %c0_9 = arith.constant 0 : index
    %c0_10 = arith.constant 0 : index
    %14 = vector.load %arg3[%c1, %c0_9, %c0_10] : memref<3x16x8xf32, #tpu.memory_space<vmem>>, vector<1x16x8xf32>
    %15 = vector.shape_cast %14 : vector<1x16x8xf32> to vector<16x8xf32>
    %cst_11 = arith.constant dense<0.000000e+00> : vector<16x256xf32>
    %16 = tpu.matmul %15, %13, %cst_11 {dimension_numbers = #tpu.dot_dimension_numbers<[1], [0], [0], [1], [0, 0, 1, 1], [], []>} : vector<16x8xf32>, vector<8x256xf32>, vector<16x256xf32> -> vector<16x256xf32>
    %c1_12 = arith.constant 1 : index
    %c0_13 = arith.constant 0 : index
    %c0_14 = arith.constant 0 : index
    %17 = vector.load %arg4[%c1_12, %c0_13, %c0_14] : memref<3x16x1xf32, #tpu.memory_space<vmem>>, vector<1x16x1xf32>
    %18 = vector.shape_cast %17 : vector<1x16x1xf32> to vector<16x1xf32>
    %19 = vector.broadcast %18 : vector<16x1xf32> to vector<16x256xf32>
    %20 = arith.addf %16, %19 : vector<16x256xf32>
    %cst_15 = arith.constant 0.000000e+00 : f32
    %21 = vector.broadcast %cst_15 : f32 to vector<16x256xf32>
    %22 = arith.maximumf %20, %21 : vector<16x256xf32>
    %23 = vector.extract_strided_slice %22 {offsets = [0, 0], sizes = [8, 256], strides = [1, 1]} : vector<16x256xf32> to vector<8x256xf32>
    %24 = vector.extract_strided_slice %22 {offsets = [8, 0], sizes = [8, 256], strides = [1, 1]} : vector<16x256xf32> to vector<8x256xf32>
    %25 = arith.addf %23, %24 : vector<8x256xf32>
    %c2 = arith.constant 2 : index
    %c0_16 = arith.constant 0 : index
    %c0_17 = arith.constant 0 : index
    %26 = vector.load %arg3[%c2, %c0_16, %c0_17] : memref<3x16x8xf32, #tpu.memory_space<vmem>>, vector<1x16x8xf32>
    %27 = vector.shape_cast %26 : vector<1x16x8xf32> to vector<16x8xf32>
    %cst_18 = arith.constant dense<0.000000e+00> : vector<16x256xf32>
    %28 = tpu.matmul %27, %25, %cst_18 {dimension_numbers = #tpu.dot_dimension_numbers<[1], [0], [0], [1], [0, 0, 1, 1], [], []>} : vector<16x8xf32>, vector<8x256xf32>, vector<16x256xf32> -> vector<16x256xf32>
    %c2_19 = arith.constant 2 : index
    %c0_20 = arith.constant 0 : index
    %c0_21 = arith.constant 0 : index
    %29 = vector.load %arg4[%c2_19, %c0_20, %c0_21] : memref<3x16x1xf32, #tpu.memory_space<vmem>>, vector<1x16x1xf32>
    %30 = vector.shape_cast %29 : vector<1x16x1xf32> to vector<16x1xf32>
    %31 = vector.broadcast %30 : vector<16x1xf32> to vector<16x256xf32>
    %32 = arith.addf %28, %31 : vector<16x256xf32>
    %cst_22 = arith.constant 0.000000e+00 : f32
    %33 = vector.broadcast %cst_22 : f32 to vector<16x256xf32>
    %34 = arith.maximumf %32, %33 : vector<16x256xf32>
    %35 = vector.extract_strided_slice %34 {offsets = [0, 0], sizes = [8, 256], strides = [1, 1]} : vector<16x256xf32> to vector<8x256xf32>
    %36 = vector.extract_strided_slice %34 {offsets = [8, 0], sizes = [8, 256], strides = [1, 1]} : vector<16x256xf32> to vector<8x256xf32>
    %c0_23 = arith.constant 0 : index
    %c0_24 = arith.constant 0 : index
    %c0_25 = arith.constant 0 : index
    %c0_26 = arith.constant 0 : index
    %37 = vector.load %arg5[%c0_23, %c0_24, %c0_25, %c0_26] : memref<2x1x8x256xf32, #tpu.memory_space<vmem>>, vector<1x1x8x256xf32>
    %38 = vector.shape_cast %37 : vector<1x1x8x256xf32> to vector<8x256xf32>
    %39 = vector.shape_cast %35 : vector<8x256xf32> to vector<1x1x8x256xf32>
    tpu.vector_store %arg5[%c0_23, %c0_24, %c0_25, %c0_26], %39 {strides = array<i32>} : memref<2x1x8x256xf32, #tpu.memory_space<vmem>>, vector<1x1x8x256xf32>,
    %c1_27 = arith.constant 1 : index
    %c0_28 = arith.constant 0 : index
    %c0_29 = arith.constant 0 : index
    %c0_30 = arith.constant 0 : index
    %40 = vector.load %arg5[%c1_27, %c0_28, %c0_29, %c0_30] : memref<2x1x8x256xf32, #tpu.memory_space<vmem>>, vector<1x1x8x256xf32>
    %41 = vector.shape_cast %40 : vector<1x1x8x256xf32> to vector<8x256xf32>
    %42 = vector.shape_cast %36 : vector<8x256xf32> to vector<1x1x8x256xf32>
    tpu.vector_store %arg5[%c1_27, %c0_28, %c0_29, %c0_30], %42 {strides = array<i32>} : memref<2x1x8x256xf32, #tpu.memory_space<vmem>>, vector<1x1x8x256xf32>,
    return
  }
  func.func @transform_0(%arg0: i32, %arg1: i32) -> (i32, i32, i32) {
    %c0_i32 = arith.constant 0 : i32
    %c0_i32_0 = arith.constant 0 : i32
    return %arg0, %c0_i32, %arg1 : i32, i32, i32
  }
  func.func @transform_1(%arg0: i32, %arg1: i32) -> (i32, i32, i32) {
    %c0_i32 = arith.constant 0 : i32
    %c0_i32_0 = arith.constant 0 : i32
    %c0_i32_1 = arith.constant 0 : i32
    %c0_i32_2 = arith.constant 0 : i32
    return %c0_i32, %c0_i32_0, %c0_i32_1 : i32, i32, i32
  }
  func.func @transform_2(%arg0: i32, %arg1: i32) -> (i32, i32, i32) {
    %c0_i32 = arith.constant 0 : i32
    %c0_i32_0 = arith.constant 0 : i32
    %c0_i32_1 = arith.constant 0 : i32
    %c0_i32_2 = arith.constant 0 : i32
    return %c0_i32, %c0_i32_0, %c0_i32_1 : i32, i32, i32
  }
  func.func @transform_3(%arg0: i32, %arg1: i32) -> (i32, i32, i32, i32) {
    %c0_i32 = arith.constant 0 : i32
    %c0_i32_0 = arith.constant 0 : i32
    %c0_i32_1 = arith.constant 0 : i32
    return %c0_i32, %arg0, %c0_i32_0, %arg1 : i32, i32, i32, i32
  }
}

</mosaic_0001>

<bundles_post_ra>
// kernel: squeeze.2
= control target key start
LH: loop header
LB: loop body
LE: loop exit
PB: predicated region body
PF: predicated region fallthrough
CT: control target
= control target key end

     0   :  { %s353_s8 = smov 112   ;;  %s479_s0 = inlined_call_operand.vmem [shape: f32[1,2,8,256], index: 0, kind: input, shape index: {}]   ;;  %s480_s1 = inlined_call_operand.hbm [shape: f32[2,8,16,16], index: 1, kind: output, shape index: {}]  }
   0x1   :  { %v301_v0 = vld.sshfl [vmem:[%s479_s0 + $0x10] sm:$0xff pattern:$0xb3a29180]   ;;  %v42_v1 = vld.sshfl [vmem:[%s479_s0] sm:$0xff pattern:$0xb3a29180]  }
   0x2   :  { %61 = vrot.lane.b32.xlu1 %v301_v0, %s353_s8  ;;  %43 = vrot.lane.b32.xlu0 %v42_v1, %s353_s8  ;;  %v302_v2 = vld.sshfl [vmem:[%s479_s0 + $0x14] sm:$0xff pattern:$0xb3a29180]   ;;  %v300_v3 = vld.sshfl [vmem:[%s479_s0 + $0x4] sm:$0xff pattern:$0xb3a29180]  }
   0x3   :  { %2 = vsyncpa [#allocation1], 0  ;;  %s354_s15 = smov 96   ;;  %s355_s16 = smov 80   ;;  %vm4_vm0 = vcmask 130048   ;;  %v3_v4 = vld [vmem:[%s479_s0] sm:$0xff]  }
   0x4   :  { %s356_s17 = smov 64   ;;  %s357_s18 = smov 48   ;;  %v297_v5 = vld [vmem:[%s479_s0 + $0x8] sm:$0xff]   ;;  %v298_v6 = vld [vmem:[%s479_s0 + $0x10] sm:$0xff]   ;;  %v299_v7 = vld [vmem:[%s479_s0 + $0x18] sm:$0xff]  }
   0x5   :  { %s358_s25 = smov 32   ;;  %5 = vst.msk [vmem:[#allocation0] ss:$16 sm:$0x3] %vm4_vm0, %v3_v4   ;;  %s359_s0 = smov 16  }
   0x6   :  { %70 = vrot.lane.b32.xlu1 %v302_v2, %s353_s8  ;;  %52 = vrot.lane.b32.xlu0 %v300_v3, %s353_s8  ;;  %6 = vst.msk [vmem:[#allocation0] ss:$16 sm:$0xc] %vm4_vm0, %v3_v4   ;;  %7 = vst.msk [vmem:[#allocation0] ss:$16 sm:$0x30] %vm4_vm0, %v3_v4  }
   0x7   :  { %8 = vst.msk [vmem:[#allocation0] ss:$16 sm:$0xc0] %vm4_vm0, %v3_v4   ;;  %13 = vst.msk [vmem:[#allocation0 + $0x8] ss:$16 sm:$0x3] %vm4_vm0, %v297_v5  }
   0x8   :  { %15 = vst.msk [vmem:[#allocation0 + $0x8] ss:$16 sm:$0xc] %vm4_vm0, %v297_v5   ;;  %17 = vst.msk [vmem:[#allocation0 + $0x8] ss:$16 sm:$0x30] %vm4_vm0, %v297_v5  }
   0x9   :  { %19 = vst.msk [vmem:[#allocation0 + $0x8] ss:$16 sm:$0xc0] %vm4_vm0, %v297_v5   ;;  %24 = vst.msk [vmem:[#allocation0 + $0x80] ss:$16 sm:$0x3] %vm4_vm0, %v298_v6  }
   0xa   :  { %87 = vrot.lane.b32.xlu1 %v300_v3, %s354_s15  ;;  %78 = vrot.lane.b32.xlu0 %v42_v1, %s354_s15  ;;  %26 = vst.msk [vmem:[#allocation0 + $0x80] ss:$16 sm:$0xc] %vm4_vm0, %v298_v6   ;;  %28 = vst.msk [vmem:[#allocation0 + $0x80] ss:$16 sm:$0x30] %vm4_vm0, %v298_v6  }
   0xb   :  { %30 = vst.msk [vmem:[#allocation0 + $0x80] ss:$16 sm:$0xc0] %vm4_vm0, %v298_v6   ;;  %35 = vst.msk [vmem:[#allocation0 + $0x88] ss:$16 sm:$0x3] %vm4_vm0, %v299_v7  }
   0xc   :  { %37 = vst.msk [vmem:[#allocation0 + $0x88] ss:$16 sm:$0xc] %vm4_vm0, %v299_v7   ;;  %39 = vst.msk [vmem:[#allocation0 + $0x88] ss:$16 sm:$0x30] %vm4_vm0, %v299_v7  }
   0xd   :  { %41 = vst.msk [vmem:[#allocation0 + $0x88] ss:$16 sm:$0xc0] %vm4_vm0, %v299_v7   ;;  %s360_s28 = smov [#allocation0]  }
   0xe   :  { %105 = vrot.lane.b32.xlu1 %v302_v2, %s354_s15  ;;  %96 = vrot.lane.b32.xlu0 %v301_v0, %s354_s15  ;;  %s291_s29 = sshll.u32 %s360_s28, 4  ;;  %s292_s29 = int_to_ptr.vmem [resolvable:$true] %s291_s29 }
   0xf   :  { %s329_s30 = scalar_lea.vmem %s292_s29, 4096  ;;  %p334_p1 = scmp.lt.s32.totalorder %s292_s29, %s292_s29 }
  0x10   :  { %p330_p0 = scmp.ne.s32.totalorder %s292_s29, %s329_s30  ;;  %p335_p2 = scmp.lt.s32.totalorder %s329_s30, %s329_s30 }
  0x12   :  { %122 = vrot.lane.b32.xlu1 %v300_v3, %s355_s16  ;;  %113 = vrot.lane.b32.xlu0 %v42_v1, %s355_s16  ;;  %p336_p3 = por %p335_p2, %p334_p1 }
  0x14   :  { %p337_p4 = pnand %p336_p3, %p330_p0 }
  0x16   :  { %140 = vrot.lane.b32.xlu1 %v302_v2, %s355_s16  ;;  %131 = vrot.lane.b32.xlu0 %v301_v0, %s355_s16 }
  0x1a   :  { %157 = vrot.lane.b32.xlu1 %v300_v3, %s356_s17  ;;  %148 = vrot.lane.b32.xlu0 %v42_v1, %s356_s17 }
  0x1e   :  { %175 = vrot.lane.b32.xlu1 %v302_v2, %s356_s17  ;;  %166 = vrot.lane.b32.xlu0 %v301_v0, %s356_s17 }
  0x22   :  { %192 = vrot.lane.b32.xlu1 %v300_v3, %s357_s18  ;;  %183 = vrot.lane.b32.xlu0 %v42_v1, %s357_s18 }
  0x26   :  { %210 = vrot.lane.b32.xlu1 %v302_v2, %s357_s18  ;;  %201 = vrot.lane.b32.xlu0 %v301_v0, %s357_s18 }
  0x2a   :  { %227 = vrot.lane.b32.xlu1 %v300_v3, %s358_s25  ;;  %218 = vrot.lane.b32.xlu0 %v42_v1, %s358_s25 }
  0x2e   :  { %245 = vrot.lane.b32.xlu1 %v302_v2, %s358_s25  ;;  %236 = vrot.lane.b32.xlu0 %v301_v0, %s358_s25 }
  0x32   :  { %262 = vrot.lane.b32.xlu1 %v300_v3, %s359_s0  ;;  %253 = vrot.lane.b32.xlu0 %v42_v1, %s359_s0 }
  0x36   :  { %280 = vrot.lane.b32.xlu1 %v302_v2, %s359_s0  ;;  %271 = vrot.lane.b32.xlu0 %v301_v0, %s359_s0 }
  0x74   :  { %v62_v8 = vpop.permute.xlu1 %61   ;;  %v44_v9 = vpop.permute.xlu0 %43  }
  0x75   :  { %65 = vst.msk [vmem:[#allocation0 + $0x81] ss:$8 sm:$0xf] %vm4_vm0, %v62_v8   ;;  %67 = vst.msk [vmem:[#allocation0 + $0x81] ss:$8 sm:$0xf0] %vm4_vm0, %v62_v8  }
  0x76   :  { %47 = vst.msk [vmem:[#allocation0 + $0x1] ss:$8 sm:$0xf] %vm4_vm0, %v44_v9   ;;  %49 = vst.msk [vmem:[#allocation0 + $0x1] ss:$8 sm:$0xf0] %vm4_vm0, %v44_v9  }
  0x78   :  { %v71_v10 = vpop.permute.xlu1 %70   ;;  %v53_v11 = vpop.permute.xlu0 %52  }
  0x79   :  { %74 = vst.msk [vmem:[#allocation0 + $0xc1] ss:$8 sm:$0xf] %vm4_vm0, %v71_v10   ;;  %76 = vst.msk [vmem:[#allocation0 + $0xc1] ss:$8 sm:$0xf0] %vm4_vm0, %v71_v10  }
  0x7a   :  { %56 = vst.msk [vmem:[#allocation0 + $0x41] ss:$8 sm:$0xf] %vm4_vm0, %v53_v11   ;;  %58 = vst.msk [vmem:[#allocation0 + $0x41] ss:$8 sm:$0xf0] %vm4_vm0, %v53_v11  }
  0x7c   :  { %v88_v12 = vpop.permute.xlu1 %87   ;;  %v79_v13 = vpop.permute.xlu0 %78  }
  0x7d   :  { %91 = vst.msk [vmem:[#allocation0 + $0x42] ss:$8 sm:$0xf] %vm4_vm0, %v88_v12   ;;  %93 = vst.msk [vmem:[#allocation0 + $0x42] ss:$8 sm:$0xf0] %vm4_vm0, %v88_v12  }
  0x7e   :  { %82 = vst.msk [vmem:[#allocation0 + $0x2] ss:$8 sm:$0xf] %vm4_vm0, %v79_v13   ;;  %84 = vst.msk [vmem:[#allocation0 + $0x2] ss:$8 sm:$0xf0] %vm4_vm0, %v79_v13  }
  0x80   :  { %v106_v14 = vpop.permute.xlu1 %105   ;;  %v97_v15 = vpop.permute.xlu0 %96  }
  0x81   :  { %109 = vst.msk [vmem:[#allocation0 + $0xc2] ss:$8 sm:$0xf] %vm4_vm0, %v106_v14   ;;  %111 = vst.msk [vmem:[#allocation0 + $0xc2] ss:$8 sm:$0xf0] %vm4_vm0, %v106_v14  }
  0x82   :  { %100 = vst.msk [vmem:[#allocation0 + $0x82] ss:$8 sm:$0xf] %vm4_vm0, %v97_v15   ;;  %102 = vst.msk [vmem:[#allocation0 + $0x82] ss:$8 sm:$0xf0] %vm4_vm0, %v97_v15  }
  0x84   :  { %v123_v16 = vpop.permute.xlu1 %122   ;;  %v114_v17 = vpop.permute.xlu0 %113  }
  0x85   :  { %126 = vst.msk [vmem:[#allocation0 + $0x43] ss:$8 sm:$0xf] %vm4_vm0, %v123_v16   ;;  %128 = vst.msk [vmem:[#allocation0 + $0x43] ss:$8 sm:$0xf0] %vm4_vm0, %v123_v16  }
  0x86   :  { %117 = vst.msk [vmem:[#allocation0 + $0x3] ss:$8 sm:$0xf] %vm4_vm0, %v114_v17   ;;  %119 = vst.msk [vmem:[#allocation0 + $0x3] ss:$8 sm:$0xf0] %vm4_vm0, %v114_v17  }
  0x88   :  { %v141_v18 = vpop.permute.xlu1 %140   ;;  %v132_v19 = vpop.permute.xlu0 %131  }
  0x89   :  { %144 = vst.msk [vmem:[#allocation0 + $0xc3] ss:$8 sm:$0xf] %vm4_vm0, %v141_v18   ;;  %146 = vst.msk [vmem:[#allocation0 + $0xc3] ss:$8 sm:$0xf0] %vm4_vm0, %v141_v18  }
  0x8a   :  { %135 = vst.msk [vmem:[#allocation0 + $0x83] ss:$8 sm:$0xf] %vm4_vm0, %v132_v19   ;;  %137 = vst.msk [vmem:[#allocation0 + $0x83] ss:$8 sm:$0xf0] %vm4_vm0, %v132_v19  }
  0x8c   :  { %v158_v20 = vpop.permute.xlu1 %157   ;;  %v149_v21 = vpop.permute.xlu0 %148  }
  0x8d   :  { %161 = vst.msk [vmem:[#allocation0 + $0x44] ss:$8 sm:$0xf] %vm4_vm0, %v158_v20   ;;  %163 = vst.msk [vmem:[#allocation0 + $0x44] ss:$8 sm:$0xf0] %vm4_vm0, %v158_v20  }
  0x8e   :  { %152 = vst.msk [vmem:[#allocation0 + $0x4] ss:$8 sm:$0xf] %vm4_vm0, %v149_v21   ;;  %154 = vst.msk [vmem:[#allocation0 + $0x4] ss:$8 sm:$0xf0] %vm4_vm0, %v149_v21  }
  0x90   :  { %v176_v22 = vpop.permute.xlu1 %175   ;;  %v167_v23 = vpop.permute.xlu0 %166  }
  0x91   :  { %179 = vst.msk [vmem:[#allocation0 + $0xc4] ss:$8 sm:$0xf] %vm4_vm0, %v176_v22   ;;  %181 = vst.msk [vmem:[#allocation0 + $0xc4] ss:$8 sm:$0xf0] %vm4_vm0, %v176_v22  }
  0x92   :  { %170 = vst.msk [vmem:[#allocation0 + $0x84] ss:$8 sm:$0xf] %vm4_vm0, %v167_v23   ;;  %172 = vst.msk [vmem:[#allocation0 + $0x84] ss:$8 sm:$0xf0] %vm4_vm0, %v167_v23  }
  0x94   :  { %v193_v24 = vpop.permute.xlu1 %192   ;;  %v184_v25 = vpop.permute.xlu0 %183  }
  0x95   :  { %196 = vst.msk [vmem:[#allocation0 + $0x45] ss:$8 sm:$0xf] %vm4_vm0, %v193_v24   ;;  %198 = vst.msk [vmem:[#allocation0 + $0x45] ss:$8 sm:$0xf0] %vm4_vm0, %v193_v24  }
  0x96   :  { %187 = vst.msk [vmem:[#allocation0 + $0x5] ss:$8 sm:$0xf] %vm4_vm0, %v184_v25   ;;  %189 = vst.msk [vmem:[#allocation0 + $0x5] ss:$8 sm:$0xf0] %vm4_vm0, %v184_v25  }
  0x98   :  { %v211_v26 = vpop.permute.xlu1 %210   ;;  %v202_v27 = vpop.permute.xlu0 %201  }
  0x99   :  { %214 = vst.msk [vmem:[#allocation0 + $0xc5] ss:$8 sm:$0xf] %vm4_vm0, %v211_v26   ;;  %216 = vst.msk [vmem:[#allocation0 + $0xc5] ss:$8 sm:$0xf0] %vm4_vm0, %v211_v26  }
  0x9a   :  { %205 = vst.msk [vmem:[#allocation0 + $0x85] ss:$8 sm:$0xf] %vm4_vm0, %v202_v27   ;;  %207 = vst.msk [vmem:[#allocation0 + $0x85] ss:$8 sm:$0xf0] %vm4_vm0, %v202_v27  }
  0x9c   :  { %v228_v28 = vpop.permute.xlu1 %227   ;;  %v219_v29 = vpop.permute.xlu0 %218  }
  0x9d   :  { %231 = vst.msk [vmem:[#allocation0 + $0x46] ss:$8 sm:$0xf] %vm4_vm0, %v228_v28   ;;  %233 = vst.msk [vmem:[#allocation0 + $0x46] ss:$8 sm:$0xf0] %vm4_vm0, %v228_v28  }
  0x9e   :  { %222 = vst.msk [vmem:[#allocation0 + $0x6] ss:$8 sm:$0xf] %vm4_vm0, %v219_v29   ;;  %224 = vst.msk [vmem:[#allocation0 + $0x6] ss:$8 sm:$0xf0] %vm4_vm0, %v219_v29  }
  0xa0   :  { %v246_v30 = vpop.permute.xlu1 %245   ;;  %v237_v31 = vpop.permute.xlu0 %236  }
  0xa1   :  { %249 = vst.msk [vmem:[#allocation0 + $0xc6] ss:$8 sm:$0xf] %vm4_vm0, %v246_v30   ;;  %251 = vst.msk [vmem:[#allocation0 + $0xc6] ss:$8 sm:$0xf0] %vm4_vm0, %v246_v30  }
  0xa2   :  { %240 = vst.msk [vmem:[#allocation0 + $0x86] ss:$8 sm:$0xf] %vm4_vm0, %v237_v31   ;;  %242 = vst.msk [vmem:[#allocation0 + $0x86] ss:$8 sm:$0xf0] %vm4_vm0, %v237_v31  }
  0xa4   :  { %v263_v32 = vpop.permute.xlu1 %262   ;;  %v254_v33 = vpop.permute.xlu0 %253  }
  0xa5   :  { %266 = vst.msk [vmem:[#allocation0 + $0x47] ss:$8 sm:$0xf] %vm4_vm0, %v263_v32   ;;  %268 = vst.msk [vmem:[#allocation0 + $0x47] ss:$8 sm:$0xf0] %vm4_vm0, %v263_v32  }
  0xa6   :  { %257 = vst.msk [vmem:[#allocation0 + $0x7] ss:$8 sm:$0xf] %vm4_vm0, %v254_v33   ;;  %259 = vst.msk [vmem:[#allocation0 + $0x7] ss:$8 sm:$0xf0] %vm4_vm0, %v254_v33  }
  0xa8   :  { %v281_v34 = vpop.permute.xlu1 %280   ;;  %v272_v35 = vpop.permute.xlu0 %271  }
  0xa9   :  { %284 = vst.msk [vmem:[#allocation0 + $0xc7] ss:$8 sm:$0xf] %vm4_vm0, %v281_v34   ;;  %286 = vst.msk [vmem:[#allocation0 + $0xc7] ss:$8 sm:$0xf0] %vm4_vm0, %v281_v34  }
  0xaa   :  { %275 = vst.msk [vmem:[#allocation0 + $0x87] ss:$8 sm:$0xf] %vm4_vm0, %v272_v35   ;;  %277 = vst.msk [vmem:[#allocation0 + $0x87] ss:$8 sm:$0xf0] %vm4_vm0, %v272_v35  }
  0xab   :  { %340 = shalt.err (!%p337_p4)
}
  0xac   :  { %s341_s4 = scalar_lea.hbm %s480_s1, 4096 }
  0xad   :  { %p342_p5 = scmp.ne.s32.totalorder %s480_s1, %s341_s4  ;;  %p345_p6 = scmp.lt.u32.totalorder %s341_s4, %s480_s1 }
  0xaf   :  { %p347_p7 = pnand %p345_p6, %p342_p5 }
  0xb1   :  { %350 = shalt.err (!%p347_p7)
}
  0xb2   :  { %294 = dma.vmem_to_hbm [thread:$0]  %s292_s29, 4096, %s480_s1, [#allocation1]  }
  0xb3   :  { %351 = dma.done.wait [#allocation1], 4096  }
  0xb4   :  { %352 = vsyncadd [#allocation1], 4294963200 }
  0xb5   :  { %296 = vsyncpa [#allocation1], 1 }

// kernel: multi_io_net_backbone.1
= control target key start
LH: loop header
LB: loop body
LE: loop exit
PB: predicated region body
PF: predicated region fallthrough
CT: control target
= control target key end

     0   :  { %s757_s12 = smov 0   ;;  %s759_s13 = smov 0   ;;  %s875_s0 = inlined_call_operand.vmem [shape: f32[2,8,256], index: 0, kind: input, shape index: {}]   ;;  %s876_s1 = inlined_call_operand.vmem [shape: f32[3,16,8], index: 1, kind: input, shape index: {}]   ;;  %s877_s2 = inlined_call_operand.vmem [shape: f32[3,16,1], index: 2, kind: input, shape index: {}]   ;;  %s878_s3 = inlined_call_operand.vmem [shape: f32[2,2,8,256], index: 3, kind: output, shape index: {}]  }
   0x1   :  { %s761_s14 = smov 0   ;;  %s763_s15 = smov 0  }
   0x2   :  { %s765_s16 = smov 0  }
   0x3 LB: > { %s618_s17 = sadd.s32 4294967295, %s733_s16   ;;  %s25_s18 = sadd.s32 1, %s729_s15  ;;  %s733_s16 = sphi %s765_s16, %s13_s16   ;;  %s729_s15 = sphi %s763_s15, %s883_s15   ;;  %s725_s14 = sphi %s761_s14, %s882_s14   ;;  %s721_s13 = sphi %s759_s13, %s881_s13   ;;  %s717_s12 = sphi %s757_s12, %s880_s12  }
   0x4   : > { %p27_p0 = scmp.ge.s32.totalorder %s25_s18, 2  ;;  %s104_s19 = sadd.s32 1, %s721_s13 }
   0x5   : > { %p114_p1 = scmp.ne.s32.totalorder %s721_s13, %s717_s12  ;;  %p115_p2 = scmp.eq.s32.totalorder %s618_s17, 1 }
   0x6   : > { %s885_s18 = smov (%p27_p0, %s25_s18), 0  ;;  %p622_p4 = scmp.ge.s32.totalorder %s733_s16, 1 }
   0x7   : > { %p789_p3 = por %p115_p2, %p114_p1  ;;  %s99_s21 = ssub.s32 %s729_s15, %s885_s18 }
   0x8   : > { %p158_p5 = scmp.lt.s32.totalorder %s733_s16, 3  ;;  %p102_p6 = scmp.eq.s32.totalorder %s99_s21, 0 }
   0xa   : > { %p159_p7 = pnand %p622_p4, %p158_p5 }
   0xb   : > { %s798_s22 = scalar_select %p102_p6, %s721_s13, %s104_s19  }
   0xc   : > { %162 = sbr.rel (%p159_p7) target bundleno = 702 (0x2be), region = 32  ;;  %p186_p8 = scmp.lt.s32.totalorder (!%p159_p7), %s725_s14, 1  ;;  %v735_v0 = vmov (!%p159_p7), 0.0   ;;  %v200_v1 = vld [vmem:[%s877_s2] sm:$0xff] (!%p159_p7)  ;;  %v736_v2 = vmov (!%p159_p7), 0   ;;  %vm212_vm0 = vcmask (!%p159_p7), 64512  }
   0xd   : > { %283 = vmatprep.mubr.f32.mxu0 (!%p159_p7), %v735_v0  ;;  %289 = vmatprep.mubr.f32.mxu1 (!%p159_p7), %v735_v0  ;;  %v198_v3 = vld [vmem:[%s876_s1] sm:$0xff] (!%p159_p7)  ;;  %v199_v6 = vld [vmem:[%s876_s1 + $0x8] sm:$0xff] (!%p159_p7)  ;;  %v630_v9 = vld [vmem:[%s877_s2 + $0x10] sm:$0xff] (!%p159_p7)  ;;  %s182_s6 = sand.u32 (!%p159_p7), 1, %s717_s12  }
   0xe   : > { %693 = vset.pattern.permute.xlu0 (!%p159_p7), %v736_v2  ;;  %694 = vset.pattern.permute.xlu1 (!%p159_p7), %v736_v2  ;;  %v201_v7 = vld [vmem:[%s877_s2 + $0x8] sm:$0xff] (!%p159_p7)  ;;  %v636_v8 = vld [vmem:[%s877_s2 + $0x20] sm:$0xff] (!%p159_p7)  ;;  %v631_v10 = vld [vmem:[%s877_s2 + $0x18] sm:$0xff] (!%p159_p7)  ;;  %s623_s7 = sshll.u32 (!%p159_p7), %s182_s6, 5 }
   0xf   : > { %204 = vperm.xlu0 (!%p159_p7), %693, %v200_v1   ;;  %310 = vperm.xlu1 (!%p159_p7), %694, %v630_v9   ;;  %v637_v11 = vld [vmem:[%s877_s2 + $0x28] sm:$0xff] (!%p159_p7)  ;;  %v628_v28 = vld [vmem:[%s876_s1 + $0x10] sm:$0xff] (!%p159_p7)  ;;  %v629_v29 = vld [vmem:[%s876_s1 + $0x18] sm:$0xff] (!%p159_p7)  ;;  %s184_s8 = scalar_lea.vmem (!%p159_p7), [#allocation2], %s623_s7 }
  0x10   : > { %v634_v46 = vld [vmem:[%s876_s1 + $0x20] sm:$0xff] (!%p159_p7)  ;;  %v635_v47 = vld [vmem:[%s876_s1 + $0x28] sm:$0xff] (!%p159_p7) }
  0x13   : > { %s187_s25 = scalar_select %p186_p8, %s725_s14, 1  ;;  %209 = vperm.xlu0 %693, %v201_v7   ;;  %315 = vperm.xlu1 %694, %v631_v10  }
  0x14   : > { %s648_s12 = sshll.u32 (%p789_p3), %s725_s14, 4 }
  0x15   : > { %s647_s26 = sshll.u32 %s187_s25, 4  ;;  %s526_s11 = scalar_lea.vmem (%p789_p3), %s878_s3, %s648_s12 }
  0x16   : > { %s193_s29 = scalar_lea.vmem %s875_s0, %s647_s26 }
  0x17   : > { %v197_v4 = vld [vmem:[%s193_s29 + $0x8] sm:$0xff]  ;;  %v196_v5 = vld [vmem:[%s193_s29] sm:$0xff]  ;;  %415 = vperm.xlu0 %693, %v636_v8   ;;  %420 = vperm.xlu1 %694, %v637_v11  }
  0x18   : > { %219 = vmatprep.subr.mxu0 %v197_v4  ;;  %649 = vmatprep.subr.mxu1 %v197_v4 }
  0x19   : > { %220 = vmatpush1.msra.mxu0 %v196_v5  ;;  %650 = vmatpush1.msra.mxu1 %v196_v5 }
  0x1a   : > { %626 = vmatmul.mubr.msk.f32.vlgmr.msra.gmra.mrb[0].mxu0 %vm212_vm0, %v198_v3  ;;  %627 = vmatmul.mubr.msk.f32.vlgmr.msra.gmra.mrb[0].mxu1 %vm212_vm0, %v199_v6 }
  0x1b   : > { %388 = vmatprep.mubr.f32.mxu1 %v735_v0  ;;  %493 = vmatprep.mubr.f32.mxu0 %v735_v0 }
  0x8e   : > { %v205_v12 = vpop.permute.xlu0 %204  ;;  %v311_v30 = vpop.permute.xlu1 %310 }
  0x92   : > { %v210_v13 = vpop.permute.xlu0 %209  ;;  %v316_v34 = vpop.permute.xlu1 %315 }
  0x96   : > { %v416_v48 = vpop.permute.xlu0 %415  ;;  %v421_v54 = vpop.permute.xlu1 %420 }
  0xed   : > { %v285_v14 = vpop.f32.mrb[0].mxu0  ;;  %v291_v15 = vpop.f32.mrb[0].mxu1 }
  0xee   : > { %v286_v16 = vadd.f32 %v285_v14, %v205_v12  ;;  %v292_v17 = vadd.f32 %v291_v15, %v210_v13  ;;  %v287_v18 = vpop.f32.mrb[1].mxu0  ;;  %v293_v19 = vpop.f32.mrb[1].mxu1 }
  0xef   : > { %v288_v20 = vadd.f32 %v287_v18, %v205_v12  ;;  %v294_v21 = vadd.f32 %v293_v19, %v210_v13 }
  0xf0   : > { %v296_v22 = vmax.f32 %v286_v16, 0.0  ;;  %v298_v23 = vmax.f32 %v292_v17, 0.0 }
  0xf1   : > { %v297_v24 = vmax.f32 %v288_v20, 0.0  ;;  %v299_v25 = vmax.f32 %v294_v21, 0.0 }
  0xf2   : > { %v300_v26 = vadd.f32 %v298_v23, %v296_v22 }
  0xf3   : > { %v301_v27 = vadd.f32 %v299_v25, %v297_v24 }
  0xf5   : > { %324 = vmatprep.subr.mxu1 %v301_v27 }
  0xf6   : > { %325 = vmatpush1.msra.mxu1 %v300_v26 }
  0xf7   : > { %632 = vmatmul.mubr.msk.f32.vlgmr.msra.gmra.mrb[2].mxu1 %vm212_vm0, %v628_v28 }
  0xf8   : > { %394 = vmatprep.mubr.f32.mxu1 %v735_v0 }
  0xfb   : > { %633 = vmatmul.mubr.msk.f32.gmra.mrb[4].mxu1 %vm212_vm0, %v629_v29 }
 0x1ca   : > { %v390_v31 = vpop.f32.mrb[2].mxu1 }
 0x1cb   : > { %v392_v32 = vpop.f32.mrb[3].mxu1  ;;  %v391_v33 = vadd.f32 %v390_v31, %v311_v30 }
 0x1cc   : > { %v393_v35 = vadd.f32 %v392_v32, %v311_v30 }
 0x1cd   : > { %v401_v40 = vmax.f32 %v391_v33, 0.0 }
 0x1ce   : > { %v396_v36 = vpop.f32.mrb[4].mxu1  ;;  %v402_v42 = vmax.f32 %v393_v35, 0.0 }
 0x1cf   : > { %v397_v37 = vadd.f32 %v396_v36, %v316_v34  ;;  %v398_v38 = vpop.f32.mrb[5].mxu1 }
 0x1d0   : > { %v399_v39 = vadd.f32 %v398_v38, %v316_v34 }
 0x1d1   : > { %v403_v41 = vmax.f32 %v397_v37, 0.0 }
 0x1d2   : > { %v404_v43 = vmax.f32 %v399_v39, 0.0 }
 0x1d3   : > { %v405_v44 = vadd.f32 %v403_v41, %v401_v40 }
 0x1d4   : > { %v406_v45 = vadd.f32 %v404_v43, %v402_v42 }
 0x1d6   : > { %429 = vmatprep.subr.mxu0 %v406_v45 }
 0x1d7   : > { %430 = vmatpush1.msra.mxu0 %v405_v44 }
 0x1d8   : > { %638 = vmatmul.mubr.msk.f32.vlgmr.msra.gmra.mrb[2].mxu0 %vm212_vm0, %v634_v46 }
 0x1d9   : > { %499 = vmatprep.mubr.f32.mxu0 %v735_v0 }
 0x1dc   : > { %639 = vmatmul.mubr.msk.f32.gmra.mrb[4].mxu0 %vm212_vm0, %v635_v47 }
 0x2ab   : > { %v495_v49 = vpop.f32.mrb[2].mxu0 }
 0x2ac   : > { %v496_v50 = vadd.f32 %v495_v49, %v416_v48  ;;  %v497_v51 = vpop.f32.mrb[3].mxu0 }
 0x2ad   : > { %v498_v52 = vadd.f32 %v497_v51, %v416_v48 }
 0x2ae   : > { %v506_v53 = vmax.f32 %v496_v50, 0.0 }
 0x2af   : > { %v507_v55 = vmax.f32 %v498_v52, 0.0  ;;  %v501_v56 = vpop.f32.mrb[4].mxu0  ;;  %521 = sbr.rel (!%p789_p3) target bundleno = 702 (0x2be), region = 36 }
 0x2b0   : > { %510 = vst [vmem:[%s184_s8] sm:$0xff] %v506_v53  ;;  %v502_v57 = vadd.f32 %v501_v56, %v421_v54  ;;  %v503_v58 = vpop.f32.mrb[5].mxu0 }
 0x2b1   : > { %511 = vst [vmem:[%s184_s8 + $0x8] sm:$0xff] %v507_v55  ;;  %v504_v59 = vadd.f32 %v503_v58, %v421_v54 }
 0x2b2   : > { %v508_v60 = vmax.f32 %v502_v57, 0.0 }
 0x2b3   : > { %v509_v61 = vmax.f32 %v504_v59, 0.0 }
 0x2b4   : > { %640 = vst [vmem:[%s184_s8 + $0x10] sm:$0xff] %v508_v60 }
 0x2b5   : > { %641 = vst [vmem:[%s184_s8 + $0x18] sm:$0xff] %v509_v61 }
 0x2b7   : > { %v539_v62 = vld [vmem:[%s184_s8] sm:$0xff] }
 0x2b8   : > { %v541_v63 = vld [vmem:[%s184_s8 + $0x8] sm:$0xff]  ;;  %540 = vst [vmem:[%s526_s11] sm:$0xff] %v539_v62 }
 0x2b9   : > { %542 = vst [vmem:[%s526_s11 + $0x8] sm:$0xff] %v541_v63 }
 0x2bb   : > { %v543_v0 = vld [vmem:[%s184_s8 + $0x10] sm:$0xff] }
 0x2bc   : > { %v545_v1 = vld [vmem:[%s184_s8 + $0x18] sm:$0xff]  ;;  %544 = vst [vmem:[%s526_s11 + $0x20] sm:$0xff] %v543_v0 }
 0x2bd   : > { %546 = vst [vmem:[%s526_s11 + $0x28] sm:$0xff] %v545_v1 }
 0x2be PF: > { %s13_s16 = sadd.s32 1, %s733_s16   ;;  %s880_s12 = smov %s721_s13 }
 0x2bf   : > { %p10_p9 = scmp.ge.s32.totalorder %s13_s16, 4   ;;  %s881_s13 = smov %s798_s22 }
 0x2c0   : > { %s882_s14 = smov %s729_s15  ;;  %s883_s15 = smov %s885_s18 }
 0x2c1   :  { %12 = sbr.rel (!%p10_p9) target bundleno = 3 (0x3), region = 90 }

</bundles_post_ra>
